<compile_context>
chip_gen: v7x
topology: tpu7x:2x2x1
jax: 0.10.0
libtpu: 0.0.40
codegen_flags: <defaults>
</compile_context>

<pallas_src>
import functools

import jax
import jax.numpy as jnp
import numpy as np
from jax.experimental import pallas as pl
from jax.experimental.pallas import tpu as pltpu


# ----------------------------------------------------------------------------
# Fused Pallas kernel: n_convs x (conv3x3 [+ BN] + ReLU), fully VMEM-resident.
# ----------------------------------------------------------------------------
def _fused_block_kernel(*refs, n_convs, batch_norm, lout, inv_count, eps):
    """Ref order:
         x      (N*H, W*Cin)        bf16   lane-flattened NHWC input
         s_dn   (N*H, N*H)          f32    row-shift-down matrix (H padding)
         s_up   (N*H, N*H)          f32    row-shift-up matrix   (H padding)
         [sel   (W*Cout, Cout)      f32 ]  lane -> channel reduction  (if BN)
         [selT  (Cout, W*Cout)      f32 ]  channel -> lane broadcast  (if BN)
         per conv i:
           bmat (W*Cin_i, 3*W*Cout) bf16   fused banded 3-tap weights
           gb   (2, Cout)           f32    [gamma; beta]              (if BN)
           bias (1, W*Cout)         f32    lane-tiled bias        (if not BN)
         out    (N*H, W*Cout)
    """
    refs = list(refs)
    o_ref = refs.pop()
    it = iter(refs)
    x_ref = next(it)
    sdn_ref = next(it)
    sup_ref = next(it)
    if batch_norm:
        sel_ref = next(it)
        selT_ref = next(it)
    convs = [(next(it), next(it)) for _ in range(n_convs)]

    s_dn = sdn_ref[...]                               # (NH, NH) f32 constants
    s_up = sup_ref[...]
    if batch_norm:
        sel = sel_ref[...]                            # (Lout, C) f32
        selT = selT_ref[...]                          # (C, Lout) f32

    a_bf16 = x_ref[...]                               # (NH, Lin0) bf16
    y_act = None

    for (b_ref, aff_ref) in convs:
        # One fused bf16 MXU matmul for all three kernel rows -> (NH, 3*Lout).
        p = jnp.dot(a_bf16, b_ref[...], preferred_element_type=jnp.float32)
        p0 = p[:, 0 * lout:1 * lout]                  # 128-lane-aligned slices
        p1 = p[:, 1 * lout:2 * lout]
        p2 = p[:, 2 * lout:3 * lout]

        # H padding: shift kernel-row-0/2 contributions by +/-1 image row with
        # constant banded shift matrices (zeros across image boundaries).
        y = (p1
             + jnp.dot(s_dn, p0, preferred_element_type=jnp.float32)
             + jnp.dot(s_up, p2, preferred_element_type=jnp.float32))

        if batch_norm:
            # Training-mode batch statistics, collapsed to one affine pass.
            s1 = jnp.sum(y, axis=0, keepdims=True)            # (1, Lout)
            s2 = jnp.sum(y * y, axis=0, keepdims=True)        # (1, Lout)
            sums_c = jnp.dot(jnp.concatenate([s1, s2], axis=0), sel,
                             preferred_element_type=jnp.float32) * inv_count
            mean_c = sums_c[0:1, :]                           # (1, C)
            var_c = sums_c[1:2, :] - mean_c * mean_c          # E[y^2] - mean^2
            gb = aff_ref[...]                                 # (2, C): gamma; beta
            scale_c = gb[0:1, :] * jax.lax.rsqrt(var_c + eps)
            shift_c = gb[1:2, :] - mean_c * scale_c
            coef_l = jnp.dot(jnp.concatenate([scale_c, shift_c], axis=0), selT,
                             preferred_element_type=jnp.float32)  # (2, Lout)
            y = y * coef_l[0:1, :] + coef_l[1:2, :]
        else:
            y = y + aff_ref[...]                              # lane-tiled bias

        y_act = jnp.maximum(y, 0.0)                           # ReLU every stage
        a_bf16 = y_act.astype(jnp.bfloat16)                   # bf16 for next MXU pass

    o_ref[...] = y_act.astype(o_ref.dtype)                    # lane-dense store


# ----------------------------------------------------------------------------
# One-time constant preparation (hoisted out of the forward hot path)
# ----------------------------------------------------------------------------
def _banded_conv_mats(w_hwio, img_w):
    """(3,3,Cin,Cout) HWIO -> (W*Cin, 3*W*Cout) fused banded matrices.
    Column block dy holds B_dy[wi*Cin+ci, wo*Cout+co] = K[dy, wi-wo+1, ci, co]
    for wi-wo+1 in [0,3), 0 otherwise (SAME padding along W)."""
    kh, kw, cin, cout = w_hwio.shape
    wi = jnp.arange(img_w)[:, None]
    wo = jnp.arange(img_w)[None, :]
    dx = wi - wo + 1                                          # (W, W)
    valid = (dx >= 0) & (dx < kw)
    dxc = jnp.clip(dx, 0, kw - 1)
    blocks = w_hwio[:, dxc]                                   # (3, W, W, Cin, Cout)
    blocks = blocks * valid[None, :, :, None, None].astype(w_hwio.dtype)
    mats = blocks.transpose(0, 1, 3, 2, 4).reshape(kh, img_w * cin, img_w * cout)
    return mats.transpose(1, 0, 2).reshape(img_w * cin, kh * img_w * cout)


def _row_shift_mats(n_images, img_h):
    """0/1 shift matrices: (S_dn @ p)[r] = p[r-1] inside an image (else 0),
    (S_up @ p)[r] = p[r+1] inside an image (else 0)."""
    nh = n_images * img_h
    rows = jnp.arange(nh)
    keep_dn = (rows % img_h != 0).astype(jnp.float32)[:, None]
    keep_up = (rows % img_h != img_h - 1).astype(jnp.float32)[:, None]
    s_dn = jnp.eye(nh, k=-1, dtype=jnp.float32) * keep_dn
    s_up = jnp.eye(nh, k=1, dtype=jnp.float32) * keep_up
    return s_dn, s_up


def prepare_constants(params, *, n_images, img_h, img_w, batch_norm, triple):
    """Done once per weight update: banded conv matrices (bf16), row-shift
    matrices, channel selection matrices, packed gamma/beta (or lane-tiled bias)."""
    n_convs = 3 if triple else 2
    cout = params["conv1_w"].shape[-1]
    lout = img_w * cout

    consts = {}
    consts["s_dn"], consts["s_up"] = _row_shift_mats(n_images, img_h)

    if batch_norm:
        lane_ch = jnp.arange(lout, dtype=jnp.int32) % cout
        sel = (lane_ch[:, None] == jnp.arange(cout, dtype=jnp.int32)[None, :]
               ).astype(jnp.float32)                          # (Lout, C)
        consts["sel"] = sel
        consts["selT"] = sel.T

    for i in range(1, n_convs + 1):
        consts[f"bmat{i}"] = _banded_conv_mats(
            params[f"conv{i}_w"], img_w).astype(jnp.bfloat16)
        if batch_norm:
            # Conv bias dropped: exactly cancelled by BN mean subtraction.
            consts[f"gb{i}"] = jnp.stack(
                [params[f"bn{i}_gamma"], params[f"bn{i}_beta"]], axis=0)
        else:
            consts[f"bias{i}"] = jnp.tile(params[f"conv{i}_b"],
                                          img_w).reshape(1, lout)
    return consts


# ----------------------------------------------------------------------------
# Forward wrapper
# ----------------------------------------------------------------------------
@functools.partial(jax.jit,
                   static_argnames=("out_size", "batch_norm", "triple", "eps"))
def double_conv_block_forward(x_nchw, consts, *, out_size, batch_norm, triple,
                              eps=1e-5):
    """Pallas implementation of DoubleConvBlock.forward (NCHW in, NCHW out)."""
    n, cin, img_h, img_w = x_nchw.shape
    n_convs = 3 if triple else 2
    nh = n * img_h
    lin0 = img_w * cin
    lout = img_w * out_size

    # NCHW -> NHWC -> lane-flattened (N*H, W*Cin); bf16 feed for the MXU.
    x2d = jnp.transpose(x_nchw, (0, 2, 3, 1)).reshape(nh, lin0)
    x2d = x2d.astype(jnp.bfloat16)

    inputs = [x2d, consts["s_dn"], consts["s_up"]]
    if batch_norm:
        inputs += [consts["sel"], consts["selT"]]
    for i in range(1, n_convs + 1):
        inputs.append(consts[f"bmat{i}"])
        inputs.append(consts[f"gb{i}"] if batch_norm else consts[f"bias{i}"])

    # All operands are 2-D and fully VMEM-resident (single grid step).
    in_specs = [pl.BlockSpec(a.shape, lambda i: (0, 0)) for a in inputs]

    kernel = functools.partial(
        _fused_block_kernel, n_convs=n_convs, batch_norm=batch_norm,
        lout=lout, inv_count=1.0 / float(n * img_h * img_w), eps=eps)

    out2d = pl.pallas_call(
        kernel,
        out_shape=jax.ShapeDtypeStruct((nh, lout), x_nchw.dtype),
        grid=(1,),
        in_specs=in_specs,
        out_specs=pl.BlockSpec((nh, lout), lambda i: (0, 0)),
        compiler_params=pltpu.CompilerParams(
            dimension_semantics=("arbitrary",),
            vmem_limit_bytes=32 * 1024 * 1024),
    )(*inputs)

    # TODO(synk): keep the lane-dense NHWC slab if the consumer allows it; the
    # NHWC->NCHW transpose below is only for PyTorch-layout parity.
    out = out2d.reshape(n, img_h, img_w, out_size)
    return jnp.transpose(out, (0, 3, 1, 2))


# ----------------------------------------------------------------------------
# Deterministic parameter init (shapes per nn.Conv2d / nn.BatchNorm2d)
# ----------------------------------------------------------------------------
def init_params(key, in_size, out_size, *, batch_norm, triple):
    params = {}
    n_convs = 3 if triple else 2
    cins = [in_size] + [out_size] * (n_convs - 1)
    for i in range(1, n_convs + 1):
        cin = cins[i - 1]
        key, kw, kb = jax.random.split(key, 3)
        bound = 1.0 / np.sqrt(cin * 9)                       # PyTorch-style U(-k, k)
        params[f"conv{i}_w"] = jax.random.uniform(
            kw, (3, 3, cin, out_size), jnp.float32, -bound, bound)  # HWIO
        params[f"conv{i}_b"] = jax.random.uniform(
            kb, (out_size,), jnp.float32, -bound, bound)
        if batch_norm:
            params[f"bn{i}_gamma"] = jnp.ones((out_size,), jnp.float32)
            params[f"bn{i}_beta"] = jnp.zeros((out_size,), jnp.float32)
    return params


# ----------------------------------------------------------------------------
# Pure-JAX f32 reference (correctness check only)
# ----------------------------------------------------------------------------
def _ref_forward(x_nchw, params, *, batch_norm, triple, eps=1e-5):
    x = jnp.transpose(x_nchw, (0, 2, 3, 1))
    n_convs = 3 if triple else 2
    for i in range(1, n_convs + 1):
        w, b = params[f"conv{i}_w"], params[f"conv{i}_b"]
        x = jax.lax.conv_general_dilated(
            x, w, window_strides=(1, 1), padding="SAME",
            dimension_numbers=("NHWC", "HWIO", "NHWC")) + b
        if batch_norm:
            mean = jnp.mean(x, axis=(0, 1, 2), keepdims=True)
            var = jnp.mean(jnp.square(x - mean), axis=(0, 1, 2), keepdims=True)
            x = (x - mean) * jax.lax.rsqrt(var + eps)
            x = x * params[f"bn{i}_gamma"] + params[f"bn{i}_beta"]
        x = jnp.maximum(x, 0.0)
    return jnp.transpose(x, (0, 3, 1, 2))


# ----------------------------------------------------------------------------
if __name__ == "__main__":
    # Module config: DoubleConvBlock(in_size=4, out_size=8, batch_norm=True)
    # TODO(synk): BatchNorm running-stat (eval-mode) tracking is module state and
    #             is not modeled; kernel implements training-mode batch stats.
    BATCH_NORM, TRIPLE = True, False
    N, CIN, COUT, H, W = 2, 4, 8, 16, 16

    key = jax.random.PRNGKey(0)
    key, kx = jax.random.split(key)
    x = jax.random.normal(kx, (N, CIN, H, W), jnp.float32)   # NCHW (PyTorch)
    params = init_params(key, CIN, COUT, batch_norm=BATCH_NORM, triple=TRIPLE)

    # Constant prep hoisted out of the per-call hot path (once per weight update).
    consts = prepare_constants(params, n_images=N, img_h=H, img_w=W,
                               batch_norm=BATCH_NORM, triple=TRIPLE)
    consts = jax.block_until_ready(consts)

    out = double_conv_block_forward(x, consts, out_size=COUT,
                                    batch_norm=BATCH_NORM, triple=TRIPLE)
    out = jax.block_until_ready(out)

    ref = jax.block_until_ready(
        _ref_forward(x, params, batch_norm=BATCH_NORM, triple=TRIPLE))
    # bf16 MXU operands (per perf review) -> looser tolerance vs. the pure-f32
    # reference; any structural bug (padding/shift/BN) would be O(1), not O(1e-2).
    np.testing.assert_allclose(np.asarray(out), np.asarray(ref),
                               rtol=5e-2, atol=5e-2)

    print("KERNEL_OK")
</pallas_src>

<mosaic_0001>
module attributes {stable_mosaic.version = 11 : i64} {
  func.func @_fused_block_kernel(%arg0: i32, %arg1: memref<32x64xbf16, #tpu.memory_space<vmem>>, %arg2: memref<32x32xf32, #tpu.memory_space<vmem>>, %arg3: memref<32x32xf32, #tpu.memory_space<vmem>>, %arg4: memref<128x8xf32, #tpu.memory_space<vmem>>, %arg5: memref<8x128xf32, #tpu.memory_space<vmem>>, %arg6: memref<64x384xbf16, #tpu.memory_space<vmem>>, %arg7: memref<2x8xf32, #tpu.memory_space<vmem>>, %arg8: memref<128x384xbf16, #tpu.memory_space<vmem>>, %arg9: memref<2x8xf32, #tpu.memory_space<vmem>>, %arg10: memref<32x128xf32, #tpu.memory_space<vmem>>) attributes {dimension_semantics = [#tpu.dimension_semantics<arbitrary>], iteration_bounds = array<i64: 1>, scalar_prefetch = 0 : i64, scratch_operands = 0 : i64, tpu.core_type = #tpu.core_type<tc>, window_params = [{pipeline_mode = #tpu.pipeline_mode<synchronous>, transform_indices = @transform_0, window_bounds = array<i64: 32, 64>}, {pipeline_mode = #tpu.pipeline_mode<synchronous>, transform_indices = @transform_1, window_bounds = array<i64: 32, 32>}, {pipeline_mode = #tpu.pipeline_mode<synchronous>, transform_indices = @transform_2, window_bounds = array<i64: 32, 32>}, {pipeline_mode = #tpu.pipeline_mode<synchronous>, transform_indices = @transform_3, window_bounds = array<i64: 128, 8>}, {pipeline_mode = #tpu.pipeline_mode<synchronous>, transform_indices = @transform_4, window_bounds = array<i64: 8, 128>}, {pipeline_mode = #tpu.pipeline_mode<synchronous>, transform_indices = @transform_5, window_bounds = array<i64: 64, 384>}, {pipeline_mode = #tpu.pipeline_mode<synchronous>, transform_indices = @transform_6, window_bounds = array<i64: 2, 8>}, {pipeline_mode = #tpu.pipeline_mode<synchronous>, transform_indices = @transform_7, window_bounds = array<i64: 128, 384>}, {pipeline_mode = #tpu.pipeline_mode<synchronous>, transform_indices = @transform_8, window_bounds = array<i64: 2, 8>}, {pipeline_mode = #tpu.pipeline_mode<synchronous>, transform_indices = @transform_9, window_bounds = array<i64: 32, 128>}]} {
    %c0 = arith.constant 0 : index
    %c0_0 = arith.constant 0 : index
    %0 = vector.load %arg2[%c0, %c0_0] : memref<32x32xf32, #tpu.memory_space<vmem>>, vector<32x32xf32>
    %c0_1 = arith.constant 0 : index
    %c0_2 = arith.constant 0 : index
    %1 = vector.load %arg3[%c0_1, %c0_2] : memref<32x32xf32, #tpu.memory_space<vmem>>, vector<32x32xf32>
    %c0_3 = arith.constant 0 : index
    %c0_4 = arith.constant 0 : index
    %2 = vector.load %arg4[%c0_3, %c0_4] : memref<128x8xf32, #tpu.memory_space<vmem>>, vector<128x8xf32>
    %c0_5 = arith.constant 0 : index
    %c0_6 = arith.constant 0 : index
    %3 = vector.load %arg5[%c0_5, %c0_6] : memref<8x128xf32, #tpu.memory_space<vmem>>, vector<8x128xf32>
    %c0_7 = arith.constant 0 : index
    %c0_8 = arith.constant 0 : index
    %4 = vector.load %arg1[%c0_7, %c0_8] : memref<32x64xbf16, #tpu.memory_space<vmem>>, vector<32x64xbf16>
    %c0_9 = arith.constant 0 : index
    %c0_10 = arith.constant 0 : index
    %5 = vector.load %arg6[%c0_9, %c0_10] : memref<64x384xbf16, #tpu.memory_space<vmem>>, vector<64x384xbf16>
    %cst = arith.constant dense<0.000000e+00> : vector<32x384xf32>
    %6 = tpu.matmul %4, %5, %cst {dimension_numbers = #tpu.dot_dimension_numbers<[1], [0], [0], [1], [0, 0, 1, 1], [], []>} : vector<32x64xbf16>, vector<64x384xbf16>, vector<32x384xf32> -> vector<32x384xf32>
    %7 = vector.extract_strided_slice %6 {offsets = [0, 0], sizes = [32, 128], strides = [1, 1]} : vector<32x384xf32> to vector<32x128xf32>
    %8 = vector.extract_strided_slice %6 {offsets = [0, 128], sizes = [32, 128], strides = [1, 1]} : vector<32x384xf32> to vector<32x128xf32>
    %9 = vector.extract_strided_slice %6 {offsets = [0, 256], sizes = [32, 128], strides = [1, 1]} : vector<32x384xf32> to vector<32x128xf32>
    %cst_11 = arith.constant dense<0.000000e+00> : vector<32x128xf32>
    %10 = tpu.matmul %0, %7, %cst_11 {dimension_numbers = #tpu.dot_dimension_numbers<[1], [0], [0], [1], [0, 0, 1, 1], [], []>} : vector<32x32xf32>, vector<32x128xf32>, vector<32x128xf32> -> vector<32x128xf32>
    %11 = arith.addf %8, %10 : vector<32x128xf32>
    %cst_12 = arith.constant dense<0.000000e+00> : vector<32x128xf32>
    %12 = tpu.matmul %1, %9, %cst_12 {dimension_numbers = #tpu.dot_dimension_numbers<[1], [0], [0], [1], [0, 0, 1, 1], [], []>} : vector<32x32xf32>, vector<32x128xf32>, vector<32x128xf32> -> vector<32x128xf32>
    %13 = arith.addf %11, %12 : vector<32x128xf32>
    %cst_13 = arith.constant dense<0.000000e+00> : vector<128xf32>
    %14 = vector.multi_reduction <add>, %13, %cst_13 [0] : vector<32x128xf32> to vector<128xf32>
    %15 = vector.shape_cast %14 : vector<128xf32> to vector<1x128xf32>
    %16 = arith.mulf %13, %13 : vector<32x128xf32>
    %cst_14 = arith.constant dense<0.000000e+00> : vector<128xf32>
    %17 = vector.multi_reduction <add>, %16, %cst_14 [0] : vector<32x128xf32> to vector<128xf32>
    %18 = vector.shape_cast %17 : vector<128xf32> to vector<1x128xf32>
    %19 = tpu.concatenate %15, %18 in 0 : vector<1x128xf32>, vector<1x128xf32> -> vector<2x128xf32>
    %cst_15 = arith.constant dense<0.000000e+00> : vector<2x8xf32>
    %20 = tpu.matmul %19, %2, %cst_15 {dimension_numbers = #tpu.dot_dimension_numbers<[1], [0], [0], [1], [0, 0, 1, 1], [], []>} : vector<2x128xf32>, vector<128x8xf32>, vector<2x8xf32> -> vector<2x8xf32>
    %cst_16 = arith.constant 0.001953125 : f32
    %21 = vector.broadcast %cst_16 : f32 to vector<2x8xf32>
    %22 = arith.mulf %20, %21 : vector<2x8xf32>
    %23 = vector.extract_strided_slice %22 {offsets = [0, 0], sizes = [1, 8], strides = [1, 1]} : vector<2x8xf32> to vector<1x8xf32>
    %24 = vector.extract_strided_slice %22 {offsets = [1, 0], sizes = [1, 8], strides = [1, 1]} : vector<2x8xf32> to vector<1x8xf32>
    %25 = arith.mulf %23, %23 : vector<1x8xf32>
    %26 = arith.subf %24, %25 : vector<1x8xf32>
    %c0_17 = arith.constant 0 : index
    %c0_18 = arith.constant 0 : index
    %27 = vector.load %arg7[%c0_17, %c0_18] : memref<2x8xf32, #tpu.memory_space<vmem>>, vector<2x8xf32>
    %28 = vector.extract_strided_slice %27 {offsets = [0, 0], sizes = [1, 8], strides = [1, 1]} : vector<2x8xf32> to vector<1x8xf32>
    %cst_19 = arith.constant 9.99999974E-6 : f32
    %29 = vector.broadcast %cst_19 : f32 to vector<1x8xf32>
    %30 = arith.addf %26, %29 : vector<1x8xf32>
    %31 = math.rsqrt %30 : vector<1x8xf32>
    %32 = arith.mulf %28, %31 : vector<1x8xf32>
    %33 = vector.extract_strided_slice %27 {offsets = [1, 0], sizes = [1, 8], strides = [1, 1]} : vector<2x8xf32> to vector<1x8xf32>
    %34 = arith.mulf %23, %32 : vector<1x8xf32>
    %35 = arith.subf %33, %34 : vector<1x8xf32>
    %36 = tpu.concatenate %32, %35 in 0 : vector<1x8xf32>, vector<1x8xf32> -> vector<2x8xf32>
    %cst_20 = arith.constant dense<0.000000e+00> : vector<2x128xf32>
    %37 = tpu.matmul %36, %3, %cst_20 {dimension_numbers = #tpu.dot_dimension_numbers<[1], [0], [0], [1], [0, 0, 1, 1], [], []>} : vector<2x8xf32>, vector<8x128xf32>, vector<2x128xf32> -> vector<2x128xf32>
    %38 = vector.extract_strided_slice %37 {offsets = [0, 0], sizes = [1, 128], strides = [1, 1]} : vector<2x128xf32> to vector<1x128xf32>
    %39 = vector.broadcast %38 : vector<1x128xf32> to vector<32x128xf32>
    %40 = arith.mulf %13, %39 : vector<32x128xf32>
    %41 = vector.extract_strided_slice %37 {offsets = [1, 0], sizes = [1, 128], strides = [1, 1]} : vector<2x128xf32> to vector<1x128xf32>
    %42 = vector.broadcast %41 : vector<1x128xf32> to vector<32x128xf32>
    %43 = arith.addf %40, %42 : vector<32x128xf32>
    %cst_21 = arith.constant 0.000000e+00 : f32
    %44 = vector.broadcast %cst_21 : f32 to vector<32x128xf32>
    %45 = arith.maximumf %43, %44 : vector<32x128xf32>
    %46 = arith.truncf %45 : vector<32x128xf32> to vector<32x128xbf16>
    %c0_22 = arith.constant 0 : index
    %c0_23 = arith.constant 0 : index
    %47 = vector.load %arg8[%c0_22, %c0_23] : memref<128x384xbf16, #tpu.memory_space<vmem>>, vector<128x384xbf16>
    %cst_24 = arith.constant dense<0.000000e+00> : vector<32x384xf32>
    %48 = tpu.matmul %46, %47, %cst_24 {dimension_numbers = #tpu.dot_dimension_numbers<[1], [0], [0], [1], [0, 0, 1, 1], [], []>} : vector<32x128xbf16>, vector<128x384xbf16>, vector<32x384xf32> -> vector<32x384xf32>
    %49 = vector.extract_strided_slice %48 {offsets = [0, 0], sizes = [32, 128], strides = [1, 1]} : vector<32x384xf32> to vector<32x128xf32>
    %50 = vector.extract_strided_slice %48 {offsets = [0, 128], sizes = [32, 128], strides = [1, 1]} : vector<32x384xf32> to vector<32x128xf32>
    %51 = vector.extract_strided_slice %48 {offsets = [0, 256], sizes = [32, 128], strides = [1, 1]} : vector<32x384xf32> to vector<32x128xf32>
    %cst_25 = arith.constant dense<0.000000e+00> : vector<32x128xf32>
    %52 = tpu.matmul %0, %49, %cst_25 {dimension_numbers = #tpu.dot_dimension_numbers<[1], [0], [0], [1], [0, 0, 1, 1], [], []>} : vector<32x32xf32>, vector<32x128xf32>, vector<32x128xf32> -> vector<32x128xf32>
    %53 = arith.addf %50, %52 : vector<32x128xf32>
    %cst_26 = arith.constant dense<0.000000e+00> : vector<32x128xf32>
    %54 = tpu.matmul %1, %51, %cst_26 {dimension_numbers = #tpu.dot_dimension_numbers<[1], [0], [0], [1], [0, 0, 1, 1], [], []>} : vector<32x32xf32>, vector<32x128xf32>, vector<32x128xf32> -> vector<32x128xf32>
    %55 = arith.addf %53, %54 : vector<32x128xf32>
    %cst_27 = arith.constant dense<0.000000e+00> : vector<128xf32>
    %56 = vector.multi_reduction <add>, %55, %cst_27 [0] : vector<32x128xf32> to vector<128xf32>
    %57 = vector.shape_cast %56 : vector<128xf32> to vector<1x128xf32>
    %58 = arith.mulf %55, %55 : vector<32x128xf32>
    %cst_28 = arith.constant dense<0.000000e+00> : vector<128xf32>
    %59 = vector.multi_reduction <add>, %58, %cst_28 [0] : vector<32x128xf32> to vector<128xf32>
    %60 = vector.shape_cast %59 : vector<128xf32> to vector<1x128xf32>
    %61 = tpu.concatenate %57, %60 in 0 : vector<1x128xf32>, vector<1x128xf32> -> vector<2x128xf32>
    %cst_29 = arith.constant dense<0.000000e+00> : vector<2x8xf32>
    %62 = tpu.matmul %61, %2, %cst_29 {dimension_numbers = #tpu.dot_dimension_numbers<[1], [0], [0], [1], [0, 0, 1, 1], [], []>} : vector<2x128xf32>, vector<128x8xf32>, vector<2x8xf32> -> vector<2x8xf32>
    %cst_30 = arith.constant 0.001953125 : f32
    %63 = vector.broadcast %cst_30 : f32 to vector<2x8xf32>
    %64 = arith.mulf %62, %63 : vector<2x8xf32>
    %65 = vector.extract_strided_slice %64 {offsets = [0, 0], sizes = [1, 8], strides = [1, 1]} : vector<2x8xf32> to vector<1x8xf32>
    %66 = vector.extract_strided_slice %64 {offsets = [1, 0], sizes = [1, 8], strides = [1, 1]} : vector<2x8xf32> to vector<1x8xf32>
    %67 = arith.mulf %65, %65 : vector<1x8xf32>
    %68 = arith.subf %66, %67 : vector<1x8xf32>
    %c0_31 = arith.constant 0 : index
    %c0_32 = arith.constant 0 : index
    %69 = vector.load %arg9[%c0_31, %c0_32] : memref<2x8xf32, #tpu.memory_space<vmem>>, vector<2x8xf32>
    %70 = vector.extract_strided_slice %69 {offsets = [0, 0], sizes = [1, 8], strides = [1, 1]} : vector<2x8xf32> to vector<1x8xf32>
    %cst_33 = arith.constant 9.99999974E-6 : f32
    %71 = vector.broadcast %cst_33 : f32 to vector<1x8xf32>
    %72 = arith.addf %68, %71 : vector<1x8xf32>
    %73 = math.rsqrt %72 : vector<1x8xf32>
    %74 = arith.mulf %70, %73 : vector<1x8xf32>
    %75 = vector.extract_strided_slice %69 {offsets = [1, 0], sizes = [1, 8], strides = [1, 1]} : vector<2x8xf32> to vector<1x8xf32>
    %76 = arith.mulf %65, %74 : vector<1x8xf32>
    %77 = arith.subf %75, %76 : vector<1x8xf32>
    %78 = tpu.concatenate %74, %77 in 0 : vector<1x8xf32>, vector<1x8xf32> -> vector<2x8xf32>
    %cst_34 = arith.constant dense<0.000000e+00> : vector<2x128xf32>
    %79 = tpu.matmul %78, %3, %cst_34 {dimension_numbers = #tpu.dot_dimension_numbers<[1], [0], [0], [1], [0, 0, 1, 1], [], []>} : vector<2x8xf32>, vector<8x128xf32>, vector<2x128xf32> -> vector<2x128xf32>
    %80 = vector.extract_strided_slice %79 {offsets = [0, 0], sizes = [1, 128], strides = [1, 1]} : vector<2x128xf32> to vector<1x128xf32>
    %81 = vector.broadcast %80 : vector<1x128xf32> to vector<32x128xf32>
    %82 = arith.mulf %55, %81 : vector<32x128xf32>
    %83 = vector.extract_strided_slice %79 {offsets = [1, 0], sizes = [1, 128], strides = [1, 1]} : vector<2x128xf32> to vector<1x128xf32>
    %84 = vector.broadcast %83 : vector<1x128xf32> to vector<32x128xf32>
    %85 = arith.addf %82, %84 : vector<32x128xf32>
    %cst_35 = arith.constant 0.000000e+00 : f32
    %86 = vector.broadcast %cst_35 : f32 to vector<32x128xf32>
    %87 = arith.maximumf %85, %86 : vector<32x128xf32>
    %c0_36 = arith.constant 0 : index
    %c0_37 = arith.constant 0 : index
    %88 = vector.load %arg10[%c0_36, %c0_37] : memref<32x128xf32, #tpu.memory_space<vmem>>, vector<32x128xf32>
    tpu.vector_store %arg10[%c0_36, %c0_37], %87 {strides = array<i32>} : memref<32x128xf32, #tpu.memory_space<vmem>>, vector<32x128xf32>,
    return
  }
  func.func @transform_0(%arg0: i32) -> (i32, i32) {
    %c0_i32 = arith.constant 0 : i32
    %c0_i32_0 = arith.constant 0 : i32
    %c0_i32_1 = arith.constant 0 : i32
    return %c0_i32, %c0_i32_0 : i32, i32
  }
  func.func @transform_1(%arg0: i32) -> (i32, i32) {
    %c0_i32 = arith.constant 0 : i32
    %c0_i32_0 = arith.constant 0 : i32
    %c0_i32_1 = arith.constant 0 : i32
    return %c0_i32, %c0_i32_0 : i32, i32
  }
  func.func @transform_2(%arg0: i32) -> (i32, i32) {
    %c0_i32 = arith.constant 0 : i32
    %c0_i32_0 = arith.constant 0 : i32
    %c0_i32_1 = arith.constant 0 : i32
    return %c0_i32, %c0_i32_0 : i32, i32
  }
  func.func @transform_3(%arg0: i32) -> (i32, i32) {
    %c0_i32 = arith.constant 0 : i32
    %c0_i32_0 = arith.constant 0 : i32
    %c0_i32_1 = arith.constant 0 : i32
    return %c0_i32, %c0_i32_0 : i32, i32
  }
  func.func @transform_4(%arg0: i32) -> (i32, i32) {
    %c0_i32 = arith.constant 0 : i32
    %c0_i32_0 = arith.constant 0 : i32
    %c0_i32_1 = arith.constant 0 : i32
    return %c0_i32, %c0_i32_0 : i32, i32
  }
  func.func @transform_5(%arg0: i32) -> (i32, i32) {
    %c0_i32 = arith.constant 0 : i32
    %c0_i32_0 = arith.constant 0 : i32
    %c0_i32_1 = arith.constant 0 : i32
    return %c0_i32, %c0_i32_0 : i32, i32
  }
  func.func @transform_6(%arg0: i32) -> (i32, i32) {
    %c0_i32 = arith.constant 0 : i32
    %c0_i32_0 = arith.constant 0 : i32
    %c0_i32_1 = arith.constant 0 : i32
    return %c0_i32, %c0_i32_0 : i32, i32
  }
  func.func @transform_7(%arg0: i32) -> (i32, i32) {
    %c0_i32 = arith.constant 0 : i32
    %c0_i32_0 = arith.constant 0 : i32
    %c0_i32_1 = arith.constant 0 : i32
    return %c0_i32, %c0_i32_0 : i32, i32
  }
  func.func @transform_8(%arg0: i32) -> (i32, i32) {
    %c0_i32 = arith.constant 0 : i32
    %c0_i32_0 = arith.constant 0 : i32
    %c0_i32_1 = arith.constant 0 : i32
    return %c0_i32, %c0_i32_0 : i32, i32
  }
  func.func @transform_9(%arg0: i32) -> (i32, i32) {
    %c0_i32 = arith.constant 0 : i32
    %c0_i32_0 = arith.constant 0 : i32
    %c0_i32_1 = arith.constant 0 : i32
    return %c0_i32, %c0_i32_0 : i32, i32
  }
}

</mosaic_0001>

<bundles_post_ra>
// kernel: double_conv_block_forward.1
= control target key start
LH: loop header
LB: loop body
LE: loop exit
PB: predicated region body
PF: predicated region fallthrough
CT: control target
= control target key end

     0   :  { %v1778_v1 = vmov 0   ;;  %vm152_vm0 = vcmask 523264   ;;  %vm261_vm1 = vcmask 261120   ;;  %v1779_v41 = vmov 0.0|0.0   ;;  %s2211_s5 = inlined_call_operand.vmem [shape: bf16[64,384], index: 5, kind: input, shape index: {}]   ;;  %s2212_s0 = inlined_call_operand.vmem [shape: bf16[32,64], index: 0, kind: input, shape index: {}]   ;;  %s2213_s1 = inlined_call_operand.vmem [shape: f32[32,32], index: 1, kind: input, shape index: {}]   ;;  %s2214_s2 = inlined_call_operand.vmem [shape: f32[32,32], index: 2, kind: input, shape index: {}]   ;;  %s2215_s3 = inlined_call_operand.vmem [shape: f32[128,8], index: 3, kind: input, shape index: {}]   ;;  %s2216_s4 = inlined_call_operand.vmem [shape: f32[8,128], index: 4, kind: input, shape index: {}]   ;;  %s2217_s7 = inlined_call_operand.vmem [shape: bf16[128,384], index: 7, kind: input, shape index: {}]   ;;  %s2218_s6 = inlined_call_operand.vmem [shape: f32[2,8], index: 6, kind: input, shape index: {}]   ;;  %s2219_s8 = inlined_call_operand.vmem [shape: f32[2,8], index: 8, kind: input, shape index: {}]   ;;  %s2220_s9 = inlined_call_operand.vmem [shape: f32[32,128], index: 9, kind: output, shape index: {}]  }
   0x1   :  { %v1724_v0 = vld [vmem:[%s2211_s5 + $0x4] ss:$12 sps:$4 sm:$0xff]   ;;  %191 = vmatprep.mubr.bf16.mxu0 %v1778_v1  ;;  %v1726_v2 = vld [vmem:[%s2211_s5] ss:$12 sps:$4 sm:$0xff]   ;;  %v1727_v3 = vld [vmem:[%s2211_s5 + $0x1c] ss:$12 sps:$4 sm:$0xff]  }
   0x2   :  { %159 = vmatprep.subr.bf16.mxu0 %v1724_v0  ;;  %v1729_v4 = vld [vmem:[%s2211_s5 + $0x18] ss:$12 sps:$4 sm:$0xff]   ;;  %v1730_v5 = vld [vmem:[%s2211_s5 + $0x34] ss:$12 sps:$4 sm:$0xff]   ;;  %v1732_v6 = vld [vmem:[%s2211_s5 + $0x30] ss:$12 sps:$4 sm:$0xff]  }
   0x3   :  { %160 = vmatpush1.bf16.msra.mxu0 %v1726_v2  ;;  %v1733_v7 = vld [vmem:[%s2211_s5 + $0x4c] ss:$12 sps:$4 sm:$0xff]   ;;  %v1735_v8 = vld [vmem:[%s2211_s5 + $0x48] ss:$12 sps:$4 sm:$0xff]   ;;  %v1736_v10 = vld [vmem:[%s2212_s0] sm:$0xff]   ;;  %vm1780_vm2 = vmmov 0  }
   0x4   :  { %161 = vmatprep.subr.bf16.mxu0 %v1727_v3  ;;  %v1737_v9 = vld [vmem:[%s2211_s5 + $0x8] ss:$12 sps:$4 sm:$0xff]   ;;  %v1738_v11 = vld [vmem:[%s2211_s5 + $0x20] ss:$12 sps:$4 sm:$0xff]   ;;  %v1740_v12 = vld [vmem:[%s2211_s5 + $0x38] ss:$12 sps:$4 sm:$0xff]  }
   0x5   :  { %v1739_v13 = vld [vmem:[%s2212_s0 + $0x8] sm:$0xff]   ;;  %v1741_v14 = vld [vmem:[%s2211_s5 + $0x50] ss:$12 sps:$4 sm:$0xff]   ;;  %v1883_v15 = vld [vmem:[%s2213_s1] sm:$0xff]  ;;  %v1781_v63 = vmov 0.0   ;;  %vm486_vm3 = vcmask 1040384  }
   0x6   :  { %1492 = vmatprep.mubr.msk.f32.mxu1 %vm261_vm1, %v1883_v15  ;;  %v1890_v16 = vld [vmem:[%s2214_s2] sm:$0xff]  ;;  %v1905_v27 = vld [vmem:[%s2213_s1 + $0x8] sm:$0xff]  ;;  %v1910_v28 = vld [vmem:[%s2213_s1 + $0x10] sm:$0xff]  ;;  %vm577_vm4 = vcmask 64512  }
   0x7   :  { %162 = vmatpush1.bf16.msra.mxu0 %v1729_v4  ;;  %v1919_v32 = vld [vmem:[%s2213_s1 + $0x18] sm:$0xff]  ;;  %v1926_v36 = vld [vmem:[%s2214_s2 + $0x8] sm:$0xff]  ;;  %v1931_v37 = vld [vmem:[%s2214_s2 + $0x10] sm:$0xff] }
   0x8   :  { %163 = vmatprep.subr.bf16.mxu0 %v1730_v5  ;;  %v1940_v38 = vld [vmem:[%s2214_s2 + $0x18] sm:$0xff]  ;;  %v41_v39 = vld [vmem:[%s2215_s3] sm:$0xff]  ;;  %v42_v40 = vld [vmem:[%s2215_s3 + $0x8] sm:$0xff] }
   0x9   :  { %v1952_v42 = vpack.c.bf16 %v42_v40, %v41_v39  ;;  %v43_v43 = vld [vmem:[%s2215_s3 + $0x10] sm:$0xff]  ;;  %v44_v44 = vld [vmem:[%s2215_s3 + $0x18] sm:$0xff]  ;;  %v45_v46 = vld [vmem:[%s2215_s3 + $0x20] sm:$0xff] }
   0xa   :  { %v1962_v45 = vpack.c.bf16 %v44_v44, %v43_v43  ;;  %v46_v47 = vld [vmem:[%s2215_s3 + $0x28] sm:$0xff]  ;;  %v47_v49 = vld [vmem:[%s2215_s3 + $0x30] sm:$0xff]  ;;  %v48_v50 = vld [vmem:[%s2215_s3 + $0x38] sm:$0xff] }
   0xb   :  { %164 = vmatpush1.bf16.msra.mxu0 %v1732_v6  ;;  %v1972_v48 = vpack.c.bf16 %v46_v47, %v45_v46  ;;  %v1982_v51 = vpack.c.bf16 %v48_v50, %v47_v49  ;;  %v49_v52 = vld [vmem:[%s2215_s3 + $0x40] sm:$0xff]  ;;  %v50_v53 = vld [vmem:[%s2215_s3 + $0x48] sm:$0xff]  ;;  %v51_v55 = vld [vmem:[%s2215_s3 + $0x50] sm:$0xff] }
   0xc   :  { %165 = vmatprep.subr.bf16.mxu0 %v1733_v7  ;;  %v1992_v54 = vpack.c.bf16 %v50_v53, %v49_v52  ;;  %v52_v56 = vld [vmem:[%s2215_s3 + $0x58] sm:$0xff]  ;;  %v53_v58 = vld [vmem:[%s2215_s3 + $0x60] sm:$0xff]  ;;  %v54_v59 = vld [vmem:[%s2215_s3 + $0x68] sm:$0xff] }
   0xd   :  { %v2002_v57 = vpack.c.bf16 %v52_v56, %v51_v55  ;;  %v2012_v60 = vpack.c.bf16 %v54_v59, %v53_v58  ;;  %v55_v61 = vld [vmem:[%s2215_s3 + $0x70] sm:$0xff]  ;;  %v56_v62 = vld [vmem:[%s2215_s3 + $0x78] sm:$0xff]  ;;  %v2058_v55 = vld [vmem:[%s2216_s4] sm:$0xff] }
   0xe   :  { %v2023_v0 = vpack.c.bf16 %v56_v62, %v55_v61  ;;  %v1742_v56 = vld [vmem:[%s2217_s7] ss:$12 sps:$4 sm:$0xff]   ;;  %v1744_v58 = vld [vmem:[%s2217_s7 + $0x4] ss:$12 sps:$4 sm:$0xff]   ;;  %v1745_v59 = vld [vmem:[%s2217_s7 + $0x8] ss:$12 sps:$4 sm:$0xff]  }
   0xf   :  { %166 = vmatpush1.bf16.msra.mxu0 %v1735_v8  ;;  %v1748_v61 = vld [vmem:[%s2217_s7 + $0x1c] ss:$12 sps:$4 sm:$0xff]   ;;  %v1746_v62 = vld [vmem:[%s2217_s7 + $0x18] ss:$12 sps:$4 sm:$0xff]  }
  0x10   :  { %1472 = vmatprep.subr.bf16.mxu0 %v1737_v9 }
  0x12   :  { %1340 = vmatmul.mubr.msk.bf16.vlgmr.msra.gmra.mrb[0].mxu0 %vm152_vm0, %v1736_v10 }
  0x13   :  { %1473 = vmatpush3.bf16.msra.mxu0 %v1737_v9  ;;  %201 = vmatprep.mubr.bf16.mxu0 %v1778_v1 }
  0x14   :  { %1474 = vmatprep.subr.bf16.mxu0 %v1738_v11 }
  0x17   :  { %1475 = vmatpush3.bf16.msra.mxu0 %v1738_v11 }
  0x18   :  { %1476 = vmatprep.subr.bf16.mxu0 %v1740_v12 }
  0x1a   :  { %1341 = vmatmul.mubr.msk.bf16.gmra.mrb[4].mxu0 %vm152_vm0, %v1739_v13 }
  0x1b   :  { %1477 = vmatpush3.bf16.msra.mxu0 %v1740_v12  ;;  %1480 = vmatprep.mubr.msk.bf16.mxu0 %vm152_vm0, %v1736_v10 }
  0x1c   :  { %1478 = vmatprep.subr.bf16.mxu0 %v1741_v14 }
  0x1f   :  { %1479 = vmatpush3.bf16.msra.mxu0 %v1741_v14 }
  0x22   :  { %1481 = vmatmul.mubr.msk.bf16.vlgmr.msra.gmra.mrb[8].mxu0 %vm152_vm0, %v1739_v13 }
  0x23   :  { %1506 = vmatprep.mubr.msk.f32.mxu0 %vm261_vm1, %v1890_v16 }
  0xe5   :  { %v193_v17 = vpop.f32.mrb[0].mxu0 }
  0xe6   :  { %v1894_v18 = vpop.f32.mrb[1].mxu0 }
  0xe7   :  { %v197_v19 = vpop.f32.mrb[2].mxu0 }
  0xe8   :  { %v1640_v20 = vpack.c.bf16 %v197_v19, %v193_v17  ;;  %v1896_v21 = vpop.f32.mrb[3].mxu0 }
  0xea   :  { %1641 = vmatprep.subr.bf16.mxu1 %v1640_v20 }
  0xeb   :  { %1643 = vmatpush3.bf16.msra.mxu1 %v1640_v20 }
  0xed   :  { %v203_v22 = vpop.f32.mrb[4].mxu0 }
  0xee   :  { %v1898_v23 = vpop.f32.mrb[5].mxu0 }
  0xef   :  { %v207_v24 = vpop.f32.mrb[6].mxu0 }
  0xf0   :  { %v1644_v25 = vpack.c.bf16 %v207_v24, %v203_v22  ;;  %v1900_v26 = vpop.f32.mrb[7].mxu0 }
  0xf2   :  { %1645 = vmatprep.subr.bf16.mxu1 %v1644_v25 }
  0xf3   :  { %1647 = vmatpush3.bf16.msra.mxu1 %v1644_v25 }
  0xf4   :  { %1656 = vmatprep.subr.bf16.mxu1 %v1779_v41 }
  0xf5   :  { %v1482_v29 = vpop.f32.mrb[8].mxu0 }
  0xf6   :  { %v246_v30 = vpop.f32.mrb[9].mxu0  ;;  %1493 = vmatmul.mubr.msk.f32.vlgmr.msra.gmra.mrb[0].mxu1 %vm261_vm1, %v1905_v27 }
  0xf7   :  { %v1483_v31 = vpop.f32.mrb[10].mxu0  ;;  %1495 = vmatprep.mubr.msk.f32.mxu1 %vm261_vm1, %v1910_v28  ;;  %1658 = vmatpush3.bf16.msra.mxu1 %v1952_v42 }
  0xf8   :  { %v1652_v33 = vpack.c.bf16 %v1483_v31, %v1482_v29  ;;  %v249_v34 = vpop.f32.mrb[11].mxu0  ;;  %1659 = vmatprep.subr.bf16.mxu1 %v1779_v41 }
  0xf9   :  { %v1648_v35 = vpack.c.bf16 %v249_v34, %v246_v30 }
  0xfa   :  { %1496 = vmatmul.mubr.msk.f32.gmra.mrb[2].mxu1 %vm261_vm1, %v1919_v32 }
  0xfb   :  { %1649 = vmatprep.subr.bf16.mxu0 %v1648_v35  ;;  %1661 = vmatpush3.bf16.msra.mxu1 %v1962_v45 }
  0xfc   :  { %1651 = vmatpush3.bf16.msra.mxu0 %v1648_v35  ;;  %1662 = vmatprep.subr.bf16.mxu1 %v1779_v41 }
  0xfd   :  { %1653 = vmatprep.subr.bf16.mxu0 %v1652_v33  ;;  %1544 = vmatprep.mubr.msk.f32.mxu1 %vm1780_vm2, %v1781_v63 }
  0xff   :  { %1664 = vmatpush3.bf16.msra.mxu1 %v1972_v48 }
 0x100   :  { %1655 = vmatpush3.bf16.msra.mxu0 %v1652_v33  ;;  %1665 = vmatprep.subr.bf16.mxu1 %v1779_v41 }
 0x101   :  { %833 = vmatprep.subr.bf16.mxu0 %v1744_v58 }
 0x103   :  { %1507 = vmatmul.mubr.msk.f32.vlgmr.msra.gmra.mrb[12].mxu0 %vm261_vm1, %v1926_v36  ;;  %1667 = vmatpush3.bf16.msra.mxu1 %v1982_v51 }
 0x104   :  { %1509 = vmatprep.mubr.msk.f32.mxu0 %vm261_vm1, %v1931_v37  ;;  %1668 = vmatprep.subr.bf16.mxu1 %v1779_v41 }
 0x105   :  { %834 = vmatpush1.bf16.msra.mxu0 %v1742_v56 }
 0x106   :  { %835 = vmatprep.subr.bf16.mxu0 %v1748_v61 }
 0x107   :  { %1510 = vmatmul.mubr.msk.f32.gmra.mrb[14].mxu0 %vm261_vm1, %v1940_v38  ;;  %1670 = vmatpush3.bf16.msra.mxu1 %v1992_v54 }
 0x108   :  { %865 = vmatprep.mubr.bf16.mxu0 %v1778_v1  ;;  %1671 = vmatprep.subr.bf16.mxu1 %v1779_v41 }
 0x109   :  { %836 = vmatpush1.bf16.msra.mxu0 %v1746_v62 }
 0x10b   :  { %1673 = vmatpush3.bf16.msra.mxu1 %v2002_v57 }
 0x10c   :  { %1674 = vmatprep.subr.bf16.mxu1 %v1779_v41 }
 0x10f   :  { %1676 = vmatpush3.bf16.msra.mxu1 %v2012_v60 }
 0x110   :  { %1677 = vmatprep.subr.bf16.mxu1 %v1779_v41 }
 0x113   :  { %1679 = vmatpush3.bf16.msra.mxu1 %v2023_v0 }
 0x114   :  { %1547 = vmatprep.subr.mxu1 %v1781_v63 }
 0x1c9   :  { %v1494_v2 = vpop.f32.mrb[0].mxu1 }
 0x1ca   :  { %v360_v3 = vadd.f32 %v1494_v2, %v1896_v21  ;;  %v340_v4 = vpop.f32.mrb[1].mxu1  ;;  %v1752_v2 = vld [vmem:[%s2217_s7 + $0x34] ss:$12 sps:$4 sm:$0xff]  }
 0x1cb   :  { %v359_v5 = vadd.f32 %v340_v4, %v1894_v18  ;;  %837 = vmatprep.subr.bf16.mxu0 %v1752_v2  ;;  %v1756_v4 = vld [vmem:[%s2217_s7 + $0x4c] ss:$12 sps:$4 sm:$0xff]  }
 0x1cd   :  { %v1497_v6 = vpop.f32.mrb[2].mxu1 }
 0x1ce   :  { %v362_v7 = vadd.f32 %v1497_v6, %v1900_v26  ;;  %v350_v8 = vpop.f32.mrb[3].mxu1  ;;  %v1760_v6 = vld [vmem:[%s2217_s7 + $0x64] ss:$12 sps:$4 sm:$0xff]  }
 0x1cf   :  { %v361_v9 = vadd.f32 %v350_v8, %v1898_v23  ;;  %v1764_v8 = vld [vmem:[%s2217_s7 + $0x7c] ss:$12 sps:$4 sm:$0xff]  }
 0x1d6   :  { %v1508_v10 = vpop.f32.mrb[12].mxu0 }
 0x1d7   :  { %v2032_v11 = vadd.f32 %v1508_v10, %v360_v3  ;;  %v441_v12 = vpop.f32.mrb[13].mxu0  ;;  %v1750_v3 = vld [vmem:[%s2217_s7 + $0x30] ss:$12 sps:$4 sm:$0xff]  }
 0x1d8   :  { %v2034_v13 = vadd.f32 %v441_v12, %v359_v5  ;;  %838 = vmatpush1.bf16.msra.mxu0 %v1750_v3  ;;  %v1754_v5 = vld [vmem:[%s2217_s7 + $0x48] ss:$12 sps:$4 sm:$0xff]  }
 0x1d9   :  { %v474_v14 = vmul.f32 %v2032_v11, %v2032_v11  ;;  %839 = vmatprep.subr.bf16.mxu0 %v1756_v4 }
 0x1da   :  { %v473_v17 = vmul.f32 %v2034_v13, %v2034_v13  ;;  %v1511_v19 = vpop.f32.mrb[14].mxu0  ;;  %v464_v21 = vadd.f32 %v2032_v11, %v2034_v13 }
 0x1db   :  { %v2040_v18 = vadd.f32 %v1511_v19, %v362_v7  ;;  %v451_v20 = vpop.f32.mrb[15].mxu0  ;;  %v1758_v7 = vld [vmem:[%s2217_s7 + $0x60] ss:$12 sps:$4 sm:$0xff]  }
 0x1dc   :  { %v2044_v22 = vadd.f32 %v451_v20, %v361_v9  ;;  %v477_v23 = vadd.f32 %v474_v14, %v473_v17  ;;  %840 = vmatpush1.bf16.msra.mxu0 %v1754_v5  ;;  %v1762_v9 = vld [vmem:[%s2217_s7 + $0x78] ss:$12 sps:$4 sm:$0xff]  }
 0x1dd   :  { %v476_v26 = vmul.f32 %v2040_v18, %v2040_v18  ;;  %841 = vmatprep.subr.bf16.mxu0 %v1760_v6 }
 0x1de   :  { %v465_v24 = vadd.f32 %v464_v21, %v2044_v22  ;;  %v475_v25 = vmul.f32 %v2044_v22, %v2044_v22 }
 0x1e0   :  { %v466_v29 = vadd.f32 %v465_v24, %v2040_v18  ;;  %v478_v30 = vadd.f32 %v477_v23, %v475_v25  ;;  %842 = vmatpush1.bf16.msra.mxu0 %v1758_v7  ;;  %v564_v24 = vld [vmem:[%s2218_s6] sm:$0x3] }
 0x1e1   :  { %843 = vmatprep.subr.bf16.mxu0 %v1764_v8 }
 0x1e2   :  { %v467_v31 = vrot.slane %v466_v29, 4  ;;  %v479_v33 = vadd.f32 %v478_v30, %v476_v26 }
 0x1e4   :  { %v468_v34 = vadd.f32 %v467_v31, %v466_v29  ;;  %v480_v35 = vrot.slane %v479_v33, 4  ;;  %844 = vmatpush1.bf16.msra.mxu0 %v1762_v9 }
 0x1e6   :  { %v469_v39 = vrot.slane %v468_v34, 2  ;;  %v481_v40 = vadd.f32 %v480_v35, %v479_v33  ;;  %v1749_v33 = vld [vmem:[%s2217_s7 + $0x20] ss:$12 sps:$4 sm:$0xff]   ;;  %v1753_v35 = vld [vmem:[%s2217_s7 + $0x38] ss:$12 sps:$4 sm:$0xff]  }
 0x1e8   :  { %v470_v43 = vadd.f32 %v469_v39, %v468_v34  ;;  %v482_v44 = vrot.slane %v481_v40, 2  ;;  %v1757_v39 = vld [vmem:[%s2217_s7 + $0x50] ss:$12 sps:$4 sm:$0xff]  }
 0x1ea   :  { %v471_v46 = vrot.slane %v470_v43, 1  ;;  %v483_v47 = vadd.f32 %v482_v44, %v481_v40  ;;  %v1761_v40 = vld [vmem:[%s2217_s7 + $0x68] ss:$12 sps:$4 sm:$0xff]  }
 0x1eb   :  { %v1768_v44 = vld [vmem:[%s2217_s7 + $0x94] ss:$12 sps:$4 sm:$0xff]  }
 0x1ec   :  { %v484_v49 = vrot.slane %v483_v47, 1  ;;  %v472_v50 = vadd.f32 %v471_v46, %v470_v43  ;;  %v1765_v43 = vld [vmem:[%s2217_s7 + $0x80] ss:$12 sps:$4 sm:$0xff]   ;;  %v1766_v46 = vld [vmem:[%s2217_s7 + $0x90] ss:$12 sps:$4 sm:$0xff]   ;;  %845 = vmatprep.subr.bf16.mxu0 %v1768_v44 }
 0x1ed   :  { %846 = vmatpush1.bf16.msra.mxu0 %v1766_v46 }
 0x1ee   :  { %v485_v52 = vadd.f32 %v484_v49, %v483_v47  ;;  %v1769_v47 = vld [vmem:[%s2217_s7 + $0x98] ss:$12 sps:$4 sm:$0xff]  }
 0x1ef   :  { %v1772_v49 = vld [vmem:[%s2217_s7 + $0xac] ss:$12 sps:$4 sm:$0xff]  }
 0x1f0   :  { %v487_v53 = vsel %vm486_vm3, %v472_v50, %v485_v52  ;;  %v1770_v50 = vld [vmem:[%s2217_s7 + $0xa8] ss:$12 sps:$4 sm:$0xff]   ;;  %v1773_v52 = vld [vmem:[%s2217_s7 + $0xb0] ss:$12 sps:$4 sm:$0xff]   ;;  %847 = vmatprep.subr.bf16.mxu0 %v1772_v49 }
 0x1f1   :  { %1545 = vmatmul.mubr.f32.vlgmr.msra.gmra.mrb[4].mxu1 %v487_v53  ;;  %848 = vmatpush1.bf16.msra.mxu0 %v1770_v50  ;;  %v651_v53 = vlaneseq }
 0x1f2   :  { %1549 = vmatprep.mubr.msk.f32.mxu1 %vm1780_vm2, %v1781_v63  ;;  %1548 = vmatpush3.msra.mxu1 %v2058_v55 }
 0x1f3   :  { %1552 = vmatprep.subr.bf16.mxu1 %v1745_v59  ;;  %v2139_v56 = vshrl.u32 %v651_v53, 7 }
 0x1f5   :  { %v653_v58 = vsub.s32 0, %v2139_v56 }
 0x2c4   :  { %v554_v10 = vpop.f32.mrb[4].mxu1 }
 0x2c5   :  { %v558_v12 = vmul.f32 0.001953125, %v554_v10  ;;  %v1546_v14 = vpop.f32.mrb[5].mxu1 }
 0x2c7   :  { %v559_v17 = vmul.f32 %v558_v12, %v558_v12 }
 0x2c9   :  { %v561_v19 = vrot.slane %v559_v17, 7 }
 0x2cb   :  { %v563_v20 = vsub.f32 %v558_v12, %v561_v19 }
 0x2cd   :  { %v565_v21 = vadd.f32 1e-05, %v563_v20 }
 0x2cf   :  { %1774 = vrsqrt.f32 %v565_v21 }
 0x2d9   :  { %v1775_v23 = vpop.eup %1774 }
 0x2da   :  { %v568_v25 = vrot.slane %v1775_v23, 1 }
 0x2dc   :  { %v570_v26 = vmul.f32 %v568_v25, %v564_v24 }
 0x2de   :  { %v571_v29 = vmul.f32 %v570_v26, %v558_v12 }
 0x2e0   :  { %v573_v30 = vrot.slane %v571_v29, 7 }
 0x2e2   :  { %v575_v31 = vsub.f32 %v564_v24, %v573_v30 }
 0x2e4   :  { %v576_v34 = vsel %vm486_vm3, %v570_v26, %v575_v31 }
 0x2e5   :  { %1550 = vmatmul.mubr.msk.f32.vlgmr.msra.gmra.mrb[6].mxu1 %vm577_vm4, %v576_v34 }
 0x2e6   :  { %1553 = vmatpush3.bf16.msra.mxu1 %v1745_v59  ;;  %v661_v59 = vsub.s32 1, %v2139_v56 }
 0x2e7   :  { %1554 = vmatprep.subr.bf16.mxu1 %v1749_v33 }
 0x2ea   :  { %1555 = vmatpush3.bf16.msra.mxu1 %v1749_v33 }
 0x2eb   :  { %1556 = vmatprep.subr.bf16.mxu1 %v1753_v35 }
 0x2ee   :  { %1557 = vmatpush3.bf16.msra.mxu1 %v1753_v35 }
 0x2ef   :  { %1558 = vmatprep.subr.bf16.mxu1 %v1757_v39 }
 0x2f2   :  { %1559 = vmatpush3.bf16.msra.mxu1 %v1757_v39 }
 0x2f3   :  { %1560 = vmatprep.subr.bf16.mxu1 %v1761_v40 }
 0x2f6   :  { %1561 = vmatpush3.bf16.msra.mxu1 %v1761_v40 }
 0x2f7   :  { %1562 = vmatprep.subr.bf16.mxu1 %v1765_v43 }
 0x2fa   :  { %1563 = vmatpush3.bf16.msra.mxu1 %v1765_v43 }
 0x2fb   :  { %1564 = vmatprep.subr.bf16.mxu1 %v1769_v47 }
 0x2fe   :  { %1565 = vmatpush3.bf16.msra.mxu1 %v1769_v47 }
 0x2ff   :  { %1566 = vmatprep.subr.bf16.mxu1 %v1773_v52 }
 0x302   :  { %1567 = vmatpush3.bf16.msra.mxu1 %v1773_v52 }
 0x303   :  { %1696 = vmatprep.subr.bf16.mxu1 %v1779_v41 }
 0x3b8   :  { %v647_v61 = vpop.f32.mrb[6].mxu1 }
 0x3b9   :  { %v654_v62 = vrot.slane %v647_v61, %v653_v58  ;;  %v1551_v2 = vpop.f32.mrb[7].mxu1  ;;  %v662_v3 = vrot.slane %v647_v61, %v661_v59 }
 0x3bb   :  { %v655_v4 = vmul.f32 %v654_v62, %v2034_v13  ;;  %v656_v5 = vmul.f32 %v654_v62, %v2032_v11  ;;  %v657_v6 = vmul.f32 %v654_v62, %v2044_v22  ;;  %v658_v7 = vmul.f32 %v654_v62, %v2040_v18 }
 0x3bd   :  { %v663_v8 = vadd.f32 %v662_v3, %v655_v4  ;;  %v664_v9 = vadd.f32 %v662_v3, %v656_v5  ;;  %v665_v10 = vadd.f32 %v662_v3, %v657_v6  ;;  %v666_v12 = vadd.f32 %v662_v3, %v658_v7 }
 0x3bf   :  { %v667_v14 = vmax.f32 %v663_v8, 0.0  ;;  %v668_v17 = vmax.f32 %v664_v9, 0.0  ;;  %v669_v19 = vmax.f32 %v665_v10, 0.0  ;;  %v670_v20 = vmax.f32 %v666_v12, 0.0 }
 0x3c1   :  { %v671_v21 = vpack.c.bf16 %v668_v17, %v667_v14  ;;  %v672_v23 = vpack.c.bf16 %v670_v20, %v669_v19 }
 0x3c3   :  { %866 = vmatmul.mubr.bf16.vlgmr.msra.gmra.mrb[16].mxu0 %v671_v21  ;;  %1568 = vmatprep.mubr.bf16.mxu1 %v671_v21 }
 0x3c4   :  { %1569 = vmatmul.mubr.bf16.vlgmr.msra.gmra.mrb[8].mxu1 %v672_v23  ;;  %875 = vmatprep.mubr.bf16.mxu0 %v1778_v1 }
 0x3c5   :  { %1698 = vmatpush3.bf16.msra.mxu1 %v1952_v42  ;;  %1632 = vmatprep.mubr.msk.f32.mxu1 %vm1780_vm2, %v1781_v63 }
 0x3c6   :  { %1699 = vmatprep.subr.bf16.mxu1 %v1779_v41 }
 0x3c9   :  { %1701 = vmatpush3.bf16.msra.mxu1 %v1962_v45 }
 0x3ca   :  { %1702 = vmatprep.subr.bf16.mxu1 %v1779_v41 }
 0x3cb   :  { %876 = vmatmul.mubr.bf16.gmra.mrb[20].mxu0 %v672_v23 }
 0x3cc   :  { %1580 = vmatprep.mubr.msk.f32.mxu0 %vm261_vm1, %v1883_v15 }
 0x3cd   :  { %1704 = vmatpush3.bf16.msra.mxu1 %v1972_v48 }
 0x3ce   :  { %1705 = vmatprep.subr.bf16.mxu1 %v1779_v41 }
 0x3d1   :  { %1707 = vmatpush3.bf16.msra.mxu1 %v1982_v51 }
 0x3d2   :  { %1708 = vmatprep.subr.bf16.mxu1 %v1779_v41 }
 0x3d5   :  { %1710 = vmatpush3.bf16.msra.mxu1 %v1992_v54 }
 0x3d6   :  { %1711 = vmatprep.subr.bf16.mxu1 %v1779_v41 }
 0x3d9   :  { %1713 = vmatpush3.bf16.msra.mxu1 %v2002_v57 }
 0x3da   :  { %1714 = vmatprep.subr.bf16.mxu1 %v1779_v41 }
 0x3dd   :  { %1716 = vmatpush3.bf16.msra.mxu1 %v2012_v60 }
 0x3de   :  { %1717 = vmatprep.subr.bf16.mxu1 %v1779_v41 }
 0x3e1   :  { %1719 = vmatpush3.bf16.msra.mxu1 %v2023_v0 }
 0x496   :  { %v867_v1 = vpop.f32.mrb[16].mxu0 }
 0x497   :  { %v869_v15 = vpop.f32.mrb[17].mxu0  ;;  %v1570_v42 = vpop.f32.mrb[8].mxu1 }
 0x498   :  { %v871_v45 = vpop.f32.mrb[18].mxu0  ;;  %v920_v48 = vpop.f32.mrb[9].mxu1 }
 0x499   :  { %v1680_v51 = vpack.c.bf16 %v871_v45, %v867_v1  ;;  %v873_v11 = vpop.f32.mrb[19].mxu0  ;;  %v1571_v54 = vpop.f32.mrb[10].mxu1 }
 0x49a   :  { %v1692_v13 = vpack.c.bf16 %v1571_v54, %v1570_v42  ;;  %v923_v18 = vpop.f32.mrb[11].mxu1  ;;  %v1212_v42 = vld [vmem:[%s2219_s8] sm:$0x3] }
 0x49b   :  { %v1688_v22 = vpack.c.bf16 %v923_v18, %v920_v48  ;;  %1681 = vmatprep.subr.bf16.mxu0 %v1680_v51 }
 0x49c   :  { %1683 = vmatpush3.bf16.msra.mxu0 %v1680_v51 }
 0x49e   :  { %v877_v57 = vpop.f32.mrb[20].mxu0 }
 0x49f   :  { %v879_v24 = vpop.f32.mrb[21].mxu0 }
 0x4a0   :  { %v881_v60 = vpop.f32.mrb[22].mxu0 }
 0x4a1   :  { %v1684_v25 = vpack.c.bf16 %v881_v60, %v877_v57  ;;  %v883_v41 = vpop.f32.mrb[23].mxu0 }
 0x4a3   :  { %1685 = vmatprep.subr.bf16.mxu0 %v1684_v25 }
 0x4a4   :  { %1687 = vmatpush3.bf16.msra.mxu0 %v1684_v25 }
 0x4a5   :  { %1689 = vmatprep.subr.bf16.mxu0 %v1688_v22 }
 0x4a7   :  { %1581 = vmatmul.mubr.msk.f32.vlgmr.msra.gmra.mrb[24].mxu0 %vm261_vm1, %v1905_v27 }
 0x4a8   :  { %1691 = vmatpush3.bf16.msra.mxu0 %v1688_v22  ;;  %1583 = vmatprep.mubr.msk.f32.mxu0 %vm261_vm1, %v1910_v28 }
 0x4a9   :  { %1693 = vmatprep.subr.bf16.mxu0 %v1692_v13 }
 0x4ab   :  { %1584 = vmatmul.mubr.msk.f32.gmra.mrb[26].mxu0 %vm261_vm1, %v1919_v32 }
 0x4ac   :  { %1695 = vmatpush3.bf16.msra.mxu0 %v1692_v13  ;;  %1594 = vmatprep.mubr.msk.f32.mxu0 %vm261_vm1, %v1890_v16 }
 0x4ad   :  { %1635 = vmatprep.subr.mxu0 %v1781_v63 }
 0x4af   :  { %1595 = vmatmul.mubr.msk.f32.vlgmr.msra.gmra.mrb[28].mxu0 %vm261_vm1, %v1926_v36 }
 0x4b0   :  { %1597 = vmatprep.mubr.msk.f32.mxu0 %vm261_vm1, %v1931_v37  ;;  %1636 = vmatpush3.msra.mxu0 %v2058_v55 }
 0x4b3   :  { %1598 = vmatmul.mubr.msk.f32.gmra.mrb[30].mxu0 %vm261_vm1, %v1940_v38 }
 0x4b4   :  { %1637 = vmatprep.mubr.msk.f32.mxu0 %vm1780_vm2, %v1781_v63 }
 0x57a   :  { %v1582_v27 = vpop.f32.mrb[24].mxu0 }
 0x57b   :  { %v1021_v28 = vadd.f32 %v1582_v27, %v873_v11  ;;  %v1001_v32 = vpop.f32.mrb[25].mxu0 }
 0x57c   :  { %v1020_v16 = vadd.f32 %v1001_v32, %v869_v15 }
 0x57e   :  { %v1585_v0 = vpop.f32.mrb[26].mxu0 }
 0x57f   :  { %v1023_v26 = vadd.f32 %v1585_v0, %v883_v41  ;;  %v1011_v29 = vpop.f32.mrb[27].mxu0 }
 0x580   :  { %v1022_v30 = vadd.f32 %v1011_v29, %v879_v24 }
 0x582   :  { %v1596_v36 = vpop.f32.mrb[28].mxu0 }
 0x583   :  { %v1110_v31 = vadd.f32 %v1596_v36, %v1021_v28  ;;  %v1090_v33 = vpop.f32.mrb[29].mxu0 }
 0x584   :  { %v1109_v37 = vadd.f32 %v1090_v33, %v1020_v16 }
 0x585   :  { %v1123_v34 = vmul.f32 %v1110_v31, %v1110_v31 }
 0x586   :  { %v1122_v55 = vmul.f32 %v1109_v37, %v1109_v37  ;;  %v1599_v35 = vpop.f32.mrb[30].mxu0  ;;  %v1113_v40 = vadd.f32 %v1110_v31, %v1109_v37 }
 0x587   :  { %v1112_v39 = vadd.f32 %v1599_v35, %v1023_v26  ;;  %v1100_v38 = vpop.f32.mrb[31].mxu0 }
 0x588   :  { %v1111_v43 = vadd.f32 %v1100_v38, %v1022_v30  ;;  %v1126_v63 = vadd.f32 %v1123_v34, %v1122_v55 }
 0x589   :  { %v1125_v47 = vmul.f32 %v1112_v39, %v1112_v39 }
 0x58a   :  { %v1114_v44 = vadd.f32 %v1113_v40, %v1111_v43  ;;  %v1124_v46 = vmul.f32 %v1111_v43, %v1111_v43 }
 0x58c   :  { %v1115_v49 = vadd.f32 %v1114_v44, %v1112_v39  ;;  %v1127_v50 = vadd.f32 %v1126_v63, %v1124_v46 }
 0x58e   :  { %v1116_v52 = vrot.slane %v1115_v49, 4  ;;  %v1128_v53 = vadd.f32 %v1127_v50, %v1125_v47 }
 0x590   :  { %v1117_v61 = vadd.f32 %v1116_v52, %v1115_v49  ;;  %v1129_v62 = vrot.slane %v1128_v53, 4 }
 0x592   :  { %v1118_v2 = vrot.slane %v1117_v61, 2  ;;  %v1130_v3 = vadd.f32 %v1129_v62, %v1128_v53 }
 0x594   :  { %v1119_v4 = vadd.f32 %v1118_v2, %v1117_v61  ;;  %v1131_v5 = vrot.slane %v1130_v3, 2 }
 0x596   :  { %v1120_v6 = vrot.slane %v1119_v4, 1  ;;  %v1132_v7 = vadd.f32 %v1131_v5, %v1130_v3 }
 0x598   :  { %v1133_v8 = vrot.slane %v1132_v7, 1  ;;  %v1121_v9 = vadd.f32 %v1120_v6, %v1119_v4 }
 0x59a   :  { %v1134_v10 = vadd.f32 %v1133_v8, %v1132_v7 }
 0x59c   :  { %v1135_v12 = vsel %vm486_vm3, %v1121_v9, %v1134_v10 }
 0x59d   :  { %1633 = vmatmul.mubr.f32.vlgmr.msra.gmra.mrb[12].mxu1 %v1135_v12 }
 0x670   :  { %v1202_v14 = vpop.f32.mrb[12].mxu1 }
 0x671   :  { %v1206_v17 = vmul.f32 0.001953125, %v1202_v14  ;;  %v1634_v19 = vpop.f32.mrb[13].mxu1 }
 0x673   :  { %v1207_v20 = vmul.f32 %v1206_v17, %v1206_v17 }
 0x675   :  { %v1209_v21 = vrot.slane %v1207_v20, 7 }
 0x677   :  { %v1211_v23 = vsub.f32 %v1206_v17, %v1209_v21 }
 0x679   :  { %v1213_v1 = vadd.f32 1e-05, %v1211_v23 }
 0x67b   :  { %1776 = vrsqrt.f32 %v1213_v1 }
 0x685   :  { %v1777_v15 = vpop.eup %1776 }
 0x686   :  { %v1216_v45 = vrot.slane %v1777_v15, 1 }
 0x688   :  { %v1218_v48 = vmul.f32 %v1216_v45, %v1212_v42 }
 0x68a   :  { %v1219_v51 = vmul.f32 %v1218_v48, %v1206_v17 }
 0x68c   :  { %v1221_v11 = vrot.slane %v1219_v51, 7 }
 0x68e   :  { %v1223_v54 = vsub.f32 %v1212_v42, %v1221_v11 }
 0x690   :  { %v1224_v13 = vsel %vm486_vm3, %v1218_v48, %v1223_v54 }
 0x691   :  { %1638 = vmatmul.mubr.msk.f32.vlgmr.msra.gmra.mrb[32].mxu0 %vm577_vm4, %v1224_v13 }
 0x764   :  { %v1294_v18 = vpop.f32.mrb[32].mxu0 }
 0x765   :  { %v1301_v22 = vrot.slane %v1294_v18, %v653_v58  ;;  %v1639_v57 = vpop.f32.mrb[33].mxu0  ;;  %v1309_v24 = vrot.slane %v1294_v18, %v661_v59 }
 0x767   :  { %v1302_v60 = vmul.f32 %v1301_v22, %v1109_v37  ;;  %v1303_v25 = vmul.f32 %v1301_v22, %v1110_v31  ;;  %v1304_v41 = vmul.f32 %v1301_v22, %v1111_v43  ;;  %v1305_v27 = vmul.f32 %v1301_v22, %v1112_v39 }
 0x769   :  { %v1310_v28 = vadd.f32 %v1309_v24, %v1302_v60  ;;  %v1311_v32 = vadd.f32 %v1309_v24, %v1303_v25  ;;  %v1312_v16 = vadd.f32 %v1309_v24, %v1304_v41  ;;  %v1313_v0 = vadd.f32 %v1309_v24, %v1305_v27 }
 0x76b   :  { %v1314_v26 = vmax.f32 %v1310_v28, 0.0  ;;  %v1315_v29 = vmax.f32 %v1311_v32, 0.0  ;;  %v1316_v30 = vmax.f32 %v1312_v16, 0.0  ;;  %v1317_v36 = vmax.f32 %v1313_v0, 0.0 }
 0x76d   :  { %1318 = vst [vmem:[%s2220_s9] sm:$0xff] %v1314_v26  ;;  %1319 = vst [vmem:[%s2220_s9 + $0x8] sm:$0xff] %v1315_v29 }
 0x76e   :  { %1320 = vst [vmem:[%s2220_s9 + $0x10] sm:$0xff] %v1316_v30  ;;  %1321 = vst [vmem:[%s2220_s9 + $0x18] sm:$0xff] %v1317_v36 }

</bundles_post_ra>
